<compile_context>
chip_gen: v6e
topology: v6e:2x2x1
jax: 0.10.0
libtpu: 0.0.40
codegen_flags: <defaults>
</compile_context>

<pallas_src>
import functools

import jax
import jax.numpy as jnp
from jax.experimental import pallas as pl
from jax.experimental.pallas import tpu as pltpu


def _round_up(n, m):
    return ((n + m - 1) // m) * m


@functools.lru_cache(maxsize=1)
def _vmem_limit_bytes():
    """Per-generation VMEM budget: ~75% of physical VMEM, capped at 100 MiB."""
    try:
        cap = pltpu.get_tpu_info().vmem_capacity_bytes
    except Exception:   # query unavailable (e.g. interpret mode) -> safe value
        cap = 64 * 1024 * 1024
    return int(min(cap * 3 // 4, 100 * 1024 * 1024))


def _gru_gate_kernel(x_ref, y_ref, wzr_ref, wg_ref, ug_ref, bz_ref, o_ref):
    """One row-tile of the GRU gate.

    Refs:
      x_ref, y_ref : [tm, D]   activations (native dtype, f32 or bf16)
      wzr_ref      : [2D, 2D]  block weight [[W_z, W_r], [U_z, U_r]]
      wg_ref       : [D, D]    W_g
      ug_ref       : [D, D]    U_g
      bz_ref       : [1, D]    bias of linear_w_z
      o_ref        : [tm, D]   output
    """
    D = x_ref.shape[-1]

    x = x_ref[...]
    y = y_ref[...]

    # Block-fused z/r GEMM: contraction K = 2D fills the MXU depth on v6e/v7x.
    #   [y | x] @ [[Wz, Wr],[Uz, Ur]] = [ Wz@y + Uz@x | Wr@y + Ur@x ]
    yx = jnp.concatenate([y, x], axis=-1)                                # [tm, 2D]
    zr = jnp.dot(yx, wzr_ref[...], preferred_element_type=jnp.float32)   # [tm, 2D]
    gy = jnp.dot(y, wg_ref[...], preferred_element_type=jnp.float32)     # [tm, D]

    x_f32 = x.astype(jnp.float32)
    bz = bz_ref[...].astype(jnp.float32)

    # Slices below are lane-tile aligned when D % 128 == 0 (no hidden copies).
    z = jax.nn.sigmoid(zr[:, :D] + bz)        # sigmoid(W_z y + b_z + U_z x)
    r = jax.nn.sigmoid(zr[:, D:])             # sigmoid(W_r y + U_r x)

    # r*x stays f32 when U_g is f32 (matches the reference); bf16 only on the
    # bf16 streaming path so the fast MXU path is used.
    rx = (r * x_f32).astype(ug_ref.dtype)
    h_hat = jnp.tanh(
        gy + jnp.dot(rx, ug_ref[...], preferred_element_type=jnp.float32))

    # (1 - z) * x + z * h_hat  ==  x + z * (h_hat - x)   (one fewer multiply)
    o_ref[...] = (x_f32 + z * (h_hat - x_f32)).astype(o_ref.dtype)


@functools.partial(jax.jit, static_argnames=("tm",))
def gru_gate(x, y, params, *, tm=512):
    """GRU gate forward. x, y: [B, S, D]. Returns [B, S, D]."""
    B, S, D = x.shape
    M = B * S

    # Row tile: big (512) for HBM efficiency, capped so the grid keeps >= 2
    # steps when M allows (v7x megacore), multiple of 32 for sublane packing.
    half_rows = _round_up(pl.cdiv(M, 2), 32)
    tm_eff = max(32, min(tm, half_rows))
    M_pad = _round_up(M, tm_eff)

    x2 = x.reshape(M, D)
    y2 = y.reshape(M, D)
    if M_pad != M:
        x2 = jnp.pad(x2, ((0, M_pad - M), (0, 0)))
        y2 = jnp.pad(y2, ((0, M_pad - M), (0, 0)))

    wz, uz, bz = params["w_z"], params["u_z"], params["b_z"]
    wr, ur = params["w_r"], params["u_r"]
    wg, ug = params["w_g"], params["u_g"]

    # Block weight for the fused z/r GEMM (weights stored [D_in, D_out]).
    w_zr = jnp.concatenate(
        [jnp.concatenate([wz, wr], axis=1),      # rows contracted against y
         jnp.concatenate([uz, ur], axis=1)],     # rows contracted against x
        axis=0)                                  # [2D, 2D]
    bz2 = bz.reshape(1, D)

    row_spec = pl.BlockSpec((tm_eff, D), lambda i: (i, 0))
    wzr_spec = pl.BlockSpec((2 * D, 2 * D), lambda i: (0, 0))
    wg_spec = pl.BlockSpec((D, D), lambda i: (0, 0))
    ug_spec = pl.BlockSpec((D, D), lambda i: (0, 0))
    bias_spec = pl.BlockSpec((1, D), lambda i: (0, 0))

    act_bytes = jnp.dtype(x.dtype).itemsize
    w_bytes = jnp.dtype(wz.dtype).itemsize
    cost = pl.CostEstimate(
        flops=12 * M_pad * D * D,                 # 6 logical matmuls, 2*M*D^2 each
        transcendentals=3 * M_pad * D,            # 2 sigmoids + 1 tanh
        bytes_accessed=(3 * M_pad * D * act_bytes          # x, y in + out
                        + (6 * D * D + D) * w_bytes),      # weights + bias
    )

    out2 = pl.pallas_call(
        _gru_gate_kernel,
        out_shape=jax.ShapeDtypeStruct((M_pad, D), x.dtype),
        grid_spec=pltpu.PrefetchScalarGridSpec(
            num_scalar_prefetch=0,
            grid=(M_pad // tm_eff,),
            in_specs=[row_spec, row_spec,                  # x, y
                      wzr_spec, wg_spec, ug_spec,          # weights
                      bias_spec],                          # b_z
            out_specs=row_spec,
        ),
        compiler_params=pltpu.CompilerParams(
            dimension_semantics=("parallel",),
            vmem_limit_bytes=_vmem_limit_bytes(),
        ),
        cost_estimate=cost,
    )(x2, y2, w_zr, wg, ug, bz2)

    return out2[:M].reshape(B, S, D)


def init_params(key, d_model, dtype=jnp.float32):
    """Deterministic synthetic init matching the module's parameter shapes.

    nn.Linear(d_model, d_model) weights stored transposed as [D_in, D_out].
    linear_w_z bias is filled with -2 (as in init_bias).
    """
    keys = jax.random.split(key, 6)
    scale = 1.0 / jnp.sqrt(d_model)

    def w(k):
        return jax.random.uniform(k, (d_model, d_model), dtype=jnp.float32,
                                  minval=-scale, maxval=scale).astype(dtype)

    return {
        "w_r": w(keys[0]),
        "u_r": w(keys[1]),
        "w_z": w(keys[2]),
        "u_z": w(keys[3]),
        "w_g": w(keys[4]),
        "u_g": w(keys[5]),
        "b_z": jnp.full((d_model,), -2.0, dtype=dtype),
    }


def gru_gate_ref(x, y, params):
    """Pure-JAX reference of the PyTorch forward (for sanity check)."""
    z = jax.nn.sigmoid(y @ params["w_z"] + params["b_z"] + x @ params["u_z"])
    r = jax.nn.sigmoid(y @ params["w_r"] + x @ params["u_r"])
    h_hat = jnp.tanh(y @ params["w_g"] + (r * x) @ params["u_g"])
    return (1.0 - z) * x + z * h_hat


if __name__ == "__main__":
    key = jax.random.PRNGKey(0)
    B, S, D = 2, 8, 128  # lane-dense d_model (multiple of 128)

    k_p, k_x, k_y = jax.random.split(key, 3)
    params = init_params(k_p, D)
    x = jax.random.normal(k_x, (B, S, D), dtype=jnp.float32)
    y = jax.random.normal(k_y, (B, S, D), dtype=jnp.float32)

    # f32 path
    out = jax.block_until_ready(gru_gate(x, y, params))
    ref = gru_gate_ref(x, y, params)
    assert out.shape == (B, S, D)
    assert jnp.allclose(out, ref, atol=2e-4, rtol=2e-4), "f32 mismatch vs reference"

    # bf16 streaming path (halves HBM traffic; f32 accumulation on the MXU).
    # This is the recommended deployment dtype, especially on v5e.
    x_bf = x.astype(jnp.bfloat16)
    y_bf = y.astype(jnp.bfloat16)
    params_bf = jax.tree_util.tree_map(lambda p: p.astype(jnp.bfloat16), params)
    out_bf = jax.block_until_ready(gru_gate(x_bf, y_bf, params_bf))
    ref_bf = gru_gate_ref(
        x_bf.astype(jnp.float32), y_bf.astype(jnp.float32),
        jax.tree_util.tree_map(lambda p: p.astype(jnp.float32), params_bf))
    assert out_bf.shape == (B, S, D)
    assert jnp.allclose(out_bf.astype(jnp.float32), ref_bf, atol=5e-2, rtol=5e-2), \
        "bf16 mismatch vs reference"

    print("KERNEL_OK")
</pallas_src>

<mosaic_0001>
module attributes {stable_mosaic.version = 11 : i64} {
  func.func @_gru_gate_kernel(%arg0: i32, %arg1: memref<32x128xf32, #tpu.memory_space<vmem>>, %arg2: memref<32x128xf32, #tpu.memory_space<vmem>>, %arg3: memref<256x256xf32, #tpu.memory_space<vmem>>, %arg4: memref<128x128xf32, #tpu.memory_space<vmem>>, %arg5: memref<128x128xf32, #tpu.memory_space<vmem>>, %arg6: memref<1x128xf32, #tpu.memory_space<vmem>>, %arg7: memref<32x128xf32, #tpu.memory_space<vmem>>) attributes {dimension_semantics = [#tpu.dimension_semantics<parallel>], iteration_bounds = array<i64: 1>, scalar_prefetch = 0 : i64, scratch_operands = 0 : i64, tpu.core_type = #tpu.core_type<tc>, window_params = [{transform_indices = @transform_0, window_bounds = array<i64: 32, 128>}, {transform_indices = @transform_1, window_bounds = array<i64: 32, 128>}, {pipeline_mode = #tpu.pipeline_mode<synchronous>, transform_indices = @transform_2, window_bounds = array<i64: 256, 256>}, {pipeline_mode = #tpu.pipeline_mode<synchronous>, transform_indices = @transform_3, window_bounds = array<i64: 128, 128>}, {pipeline_mode = #tpu.pipeline_mode<synchronous>, transform_indices = @transform_4, window_bounds = array<i64: 128, 128>}, {pipeline_mode = #tpu.pipeline_mode<synchronous>, transform_indices = @transform_5, window_bounds = array<i64: 1, 128>}, {transform_indices = @transform_6, window_bounds = array<i64: 32, 128>}]} {
    %c0 = arith.constant 0 : index
    %c0_0 = arith.constant 0 : index
    %0 = vector.load %arg1[%c0, %c0_0] : memref<32x128xf32, #tpu.memory_space<vmem>>, vector<32x128xf32>
    %c0_1 = arith.constant 0 : index
    %c0_2 = arith.constant 0 : index
    %1 = vector.load %arg2[%c0_1, %c0_2] : memref<32x128xf32, #tpu.memory_space<vmem>>, vector<32x128xf32>
    %2 = tpu.concatenate %1, %0 in 1 : vector<32x128xf32>, vector<32x128xf32> -> vector<32x256xf32>
    %c0_3 = arith.constant 0 : index
    %c0_4 = arith.constant 0 : index
    %3 = vector.load %arg3[%c0_3, %c0_4] : memref<256x256xf32, #tpu.memory_space<vmem>>, vector<256x256xf32>
    %cst = arith.constant dense<0.000000e+00> : vector<32x256xf32>
    %4 = tpu.matmul %2, %3, %cst {dimension_numbers = #tpu.dot_dimension_numbers<[1], [0], [0], [1], [0, 0, 1, 1], [], []>} : vector<32x256xf32>, vector<256x256xf32>, vector<32x256xf32> -> vector<32x256xf32>
    %c0_5 = arith.constant 0 : index
    %c0_6 = arith.constant 0 : index
    %5 = vector.load %arg4[%c0_5, %c0_6] : memref<128x128xf32, #tpu.memory_space<vmem>>, vector<128x128xf32>
    %cst_7 = arith.constant dense<0.000000e+00> : vector<32x128xf32>
    %6 = tpu.matmul %1, %5, %cst_7 {dimension_numbers = #tpu.dot_dimension_numbers<[1], [0], [0], [1], [0, 0, 1, 1], [], []>} : vector<32x128xf32>, vector<128x128xf32>, vector<32x128xf32> -> vector<32x128xf32>
    %c0_8 = arith.constant 0 : index
    %c0_9 = arith.constant 0 : index
    %7 = vector.load %arg6[%c0_8, %c0_9] : memref<1x128xf32, #tpu.memory_space<vmem>>, vector<1x128xf32>
    %8 = vector.extract_strided_slice %4 {offsets = [0, 0], sizes = [32, 128], strides = [1, 1]} : vector<32x256xf32> to vector<32x128xf32>
    %9 = vector.broadcast %7 : vector<1x128xf32> to vector<32x128xf32>
    %10 = arith.addf %8, %9 : vector<32x128xf32>
    %11 = arith.negf %10 : vector<32x128xf32>
    %12 = math.exp %11 : vector<32x128xf32>
    %cst_10 = arith.constant 1.000000e+00 : f32
    %13 = vector.broadcast %cst_10 : f32 to vector<32x128xf32>
    %14 = arith.addf %13, %12 : vector<32x128xf32>
    %15 = arith.divf %13, %14 : vector<32x128xf32>
    %16 = vector.extract_strided_slice %4 {offsets = [0, 128], sizes = [32, 128], strides = [1, 1]} : vector<32x256xf32> to vector<32x128xf32>
    %17 = arith.negf %16 : vector<32x128xf32>
    %18 = math.exp %17 : vector<32x128xf32>
    %cst_11 = arith.constant 1.000000e+00 : f32
    %19 = vector.broadcast %cst_11 : f32 to vector<32x128xf32>
    %20 = arith.addf %19, %18 : vector<32x128xf32>
    %21 = arith.divf %19, %20 : vector<32x128xf32>
    %22 = arith.mulf %21, %0 : vector<32x128xf32>
    %c0_12 = arith.constant 0 : index
    %c0_13 = arith.constant 0 : index
    %23 = vector.load %arg5[%c0_12, %c0_13] : memref<128x128xf32, #tpu.memory_space<vmem>>, vector<128x128xf32>
    %cst_14 = arith.constant dense<0.000000e+00> : vector<32x128xf32>
    %24 = tpu.matmul %22, %23, %cst_14 {dimension_numbers = #tpu.dot_dimension_numbers<[1], [0], [0], [1], [0, 0, 1, 1], [], []>} : vector<32x128xf32>, vector<128x128xf32>, vector<32x128xf32> -> vector<32x128xf32>
    %25 = arith.addf %6, %24 : vector<32x128xf32>
    %26 = math.tanh %25 : vector<32x128xf32>
    %27 = arith.subf %26, %0 : vector<32x128xf32>
    %28 = arith.mulf %15, %27 : vector<32x128xf32>
    %29 = arith.addf %0, %28 : vector<32x128xf32>
    %c0_15 = arith.constant 0 : index
    %c0_16 = arith.constant 0 : index
    %30 = vector.load %arg7[%c0_15, %c0_16] : memref<32x128xf32, #tpu.memory_space<vmem>>, vector<32x128xf32>
    tpu.vector_store %arg7[%c0_15, %c0_16], %29 {strides = array<i32>} : memref<32x128xf32, #tpu.memory_space<vmem>>, vector<32x128xf32>,
    return
  }
  func.func @transform_0(%arg0: i32) -> (i32, i32) {
    %c0_i32 = arith.constant 0 : i32
    %c0_i32_0 = arith.constant 0 : i32
    return %arg0, %c0_i32 : i32, i32
  }
  func.func @transform_1(%arg0: i32) -> (i32, i32) {
    %c0_i32 = arith.constant 0 : i32
    %c0_i32_0 = arith.constant 0 : i32
    return %arg0, %c0_i32 : i32, i32
  }
  func.func @transform_2(%arg0: i32) -> (i32, i32) {
    %c0_i32 = arith.constant 0 : i32
    %c0_i32_0 = arith.constant 0 : i32
    %c0_i32_1 = arith.constant 0 : i32
    return %c0_i32, %c0_i32_0 : i32, i32
  }
  func.func @transform_3(%arg0: i32) -> (i32, i32) {
    %c0_i32 = arith.constant 0 : i32
    %c0_i32_0 = arith.constant 0 : i32
    %c0_i32_1 = arith.constant 0 : i32
    return %c0_i32, %c0_i32_0 : i32, i32
  }
  func.func @transform_4(%arg0: i32) -> (i32, i32) {
    %c0_i32 = arith.constant 0 : i32
    %c0_i32_0 = arith.constant 0 : i32
    %c0_i32_1 = arith.constant 0 : i32
    return %c0_i32, %c0_i32_0 : i32, i32
  }
  func.func @transform_5(%arg0: i32) -> (i32, i32) {
    %c0_i32 = arith.constant 0 : i32
    %c0_i32_0 = arith.constant 0 : i32
    %c0_i32_1 = arith.constant 0 : i32
    return %c0_i32, %c0_i32_0 : i32, i32
  }
  func.func @transform_6(%arg0: i32) -> (i32, i32) {
    %c0_i32 = arith.constant 0 : i32
    %c0_i32_0 = arith.constant 0 : i32
    return %arg0, %c0_i32 : i32, i32
  }
}

</mosaic_0001>

<bundles_post_ra>
// kernel: gru_gate.1
= control target key start
LH: loop header
LB: loop body
LE: loop exit
PB: predicated region body
PF: predicated region fallthrough
CT: control target
= control target key end

     0   :  { %s1052_s2 = inlined_call_operand.vmem [shape: f32[256,256], index: 2, kind: input, shape index: {}]   ;;  %s1053_s0 = inlined_call_operand.vmem [shape: f32[32,128], index: 0, kind: input, shape index: {}]   ;;  %s1054_s1 = inlined_call_operand.vmem [shape: f32[32,128], index: 1, kind: input, shape index: {}]   ;;  %s1055_s4 = inlined_call_operand.vmem [shape: f32[128,128], index: 4, kind: input, shape index: {}]   ;;  %s1056_s3 = inlined_call_operand.vmem [shape: f32[128,128], index: 3, kind: input, shape index: {}]   ;;  %s1057_s5 = inlined_call_operand.vmem [shape: f32[1,128], index: 5, kind: input, shape index: {}]   ;;  %s1058_s6 = inlined_call_operand.vmem [shape: f32[32,128], index: 6, kind: output, shape index: {}]  }
   0x1   :  { %v62_v0 = vld [vmem:[%s1052_s2 + $0xf8] sm:$0xff]  ;;  %v61_v1 = vld [vmem:[%s1052_s2 + $0xf0] sm:$0xff]  ;;  %v60_v2 = vld [vmem:[%s1052_s2 + $0xe8] sm:$0xff] }
   0x2   :  { %95 = vmatprep.subr.mxu0 %v62_v0  ;;  %v59_v3 = vld [vmem:[%s1052_s2 + $0xe0] sm:$0xff]  ;;  %v58_v4 = vld [vmem:[%s1052_s2 + $0xd8] sm:$0xff]  ;;  %v57_v5 = vld [vmem:[%s1052_s2 + $0xd0] sm:$0xff] }
   0x3   :  { %96 = vmatpush1.msra.mxu0 %v61_v1  ;;  %v56_v6 = vld [vmem:[%s1052_s2 + $0xc8] sm:$0xff]  ;;  %v55_v7 = vld [vmem:[%s1052_s2 + $0xc0] sm:$0xff]  ;;  %v54_v8 = vld [vmem:[%s1052_s2 + $0xb8] sm:$0xff] }
   0x4   :  { %97 = vmatprep.subr.mxu0 %v60_v2  ;;  %v53_v9 = vld [vmem:[%s1052_s2 + $0xb0] sm:$0xff]  ;;  %v52_v10 = vld [vmem:[%s1052_s2 + $0xa8] sm:$0xff]  ;;  %v51_v11 = vld [vmem:[%s1052_s2 + $0xa0] sm:$0xff] }
   0x5   :  { %98 = vmatpush1.msra.mxu0 %v59_v3  ;;  %v50_v12 = vld [vmem:[%s1052_s2 + $0x98] sm:$0xff]  ;;  %v49_v13 = vld [vmem:[%s1052_s2 + $0x90] sm:$0xff]  ;;  %v48_v14 = vld [vmem:[%s1052_s2 + $0x88] sm:$0xff] }
   0x6   :  { %99 = vmatprep.subr.mxu0 %v58_v4  ;;  %v47_v15 = vld [vmem:[%s1052_s2 + $0x80] sm:$0xff]  ;;  %v46_v16 = vld [vmem:[%s1052_s2 + $0x78] sm:$0xff]  ;;  %v45_v17 = vld [vmem:[%s1052_s2 + $0x70] sm:$0xff] }
   0x7   :  { %100 = vmatpush1.msra.mxu0 %v57_v5  ;;  %v44_v18 = vld [vmem:[%s1052_s2 + $0x68] sm:$0xff]  ;;  %v43_v19 = vld [vmem:[%s1052_s2 + $0x60] sm:$0xff]  ;;  %v42_v20 = vld [vmem:[%s1052_s2 + $0x58] sm:$0xff] }
   0x8   :  { %101 = vmatprep.subr.mxu0 %v56_v6  ;;  %v41_v21 = vld [vmem:[%s1052_s2 + $0x50] sm:$0xff]  ;;  %v40_v22 = vld [vmem:[%s1052_s2 + $0x48] sm:$0xff]  ;;  %v39_v23 = vld [vmem:[%s1052_s2 + $0x40] sm:$0xff] }
   0x9   :  { %102 = vmatpush1.msra.mxu0 %v55_v7  ;;  %v748_v24 = vld [vmem:[%s1053_s0] sm:$0xff]  ;;  %v38_v25 = vld [vmem:[%s1052_s2 + $0x38] sm:$0xff]  ;;  %v37_v26 = vld [vmem:[%s1052_s2 + $0x30] sm:$0xff] }
   0xa   :  { %103 = vmatprep.subr.mxu0 %v54_v8  ;;  %159 = vmatprep.mubr.f32.mxu0 %v748_v24  ;;  %v36_v27 = vld [vmem:[%s1052_s2 + $0x28] sm:$0xff]  ;;  %v35_v28 = vld [vmem:[%s1052_s2 + $0x20] sm:$0xff]  ;;  %v34_v29 = vld [vmem:[%s1052_s2 + $0x18] sm:$0xff] }
   0xb   :  { %104 = vmatpush1.msra.mxu0 %v53_v9  ;;  %v33_v30 = vld [vmem:[%s1052_s2 + $0x10] sm:$0xff]  ;;  %v32_v31 = vld [vmem:[%s1052_s2 + $0x8] sm:$0xff]  ;;  %v31_v32 = vld [vmem:[%s1052_s2] sm:$0xff] }
   0xc   :  { %105 = vmatprep.subr.mxu0 %v52_v10  ;;  %v94_v33 = vld [vmem:[%s1052_s2 + $0x1f8] sm:$0xff]  ;;  %v93_v34 = vld [vmem:[%s1052_s2 + $0x1f0] sm:$0xff]  ;;  %v92_v35 = vld [vmem:[%s1052_s2 + $0x1e8] sm:$0xff] }
   0xd   :  { %106 = vmatpush1.msra.mxu0 %v51_v11  ;;  %v91_v36 = vld [vmem:[%s1052_s2 + $0x1e0] sm:$0xff]  ;;  %v90_v37 = vld [vmem:[%s1052_s2 + $0x1d8] sm:$0xff]  ;;  %v89_v38 = vld [vmem:[%s1052_s2 + $0x1d0] sm:$0xff] }
   0xe   :  { %107 = vmatprep.subr.mxu0 %v50_v12  ;;  %v88_v39 = vld [vmem:[%s1052_s2 + $0x1c8] sm:$0xff]  ;;  %v87_v40 = vld [vmem:[%s1052_s2 + $0x1c0] sm:$0xff]  ;;  %v86_v41 = vld [vmem:[%s1052_s2 + $0x1b8] sm:$0xff] }
   0xf   :  { %108 = vmatpush1.msra.mxu0 %v49_v13  ;;  %v85_v42 = vld [vmem:[%s1052_s2 + $0x1b0] sm:$0xff]  ;;  %v84_v43 = vld [vmem:[%s1052_s2 + $0x1a8] sm:$0xff]  ;;  %v83_v44 = vld [vmem:[%s1052_s2 + $0x1a0] sm:$0xff] }
  0x10   :  { %109 = vmatprep.subr.mxu0 %v48_v14  ;;  %v82_v45 = vld [vmem:[%s1052_s2 + $0x198] sm:$0xff]  ;;  %v81_v46 = vld [vmem:[%s1052_s2 + $0x190] sm:$0xff]  ;;  %v80_v47 = vld [vmem:[%s1052_s2 + $0x188] sm:$0xff] }
  0x11   :  { %110 = vmatpush1.msra.mxu0 %v47_v15  ;;  %v79_v48 = vld [vmem:[%s1052_s2 + $0x180] sm:$0xff]  ;;  %v78_v49 = vld [vmem:[%s1052_s2 + $0x178] sm:$0xff]  ;;  %v77_v50 = vld [vmem:[%s1052_s2 + $0x170] sm:$0xff] }
  0x12   :  { %111 = vmatprep.subr.mxu0 %v46_v16  ;;  %v76_v51 = vld [vmem:[%s1052_s2 + $0x168] sm:$0xff]  ;;  %v75_v52 = vld [vmem:[%s1052_s2 + $0x160] sm:$0xff]  ;;  %v74_v53 = vld [vmem:[%s1052_s2 + $0x158] sm:$0xff] }
  0x13   :  { %112 = vmatpush1.msra.mxu0 %v45_v17  ;;  %v73_v54 = vld [vmem:[%s1052_s2 + $0x150] sm:$0xff]  ;;  %v72_v55 = vld [vmem:[%s1052_s2 + $0x148] sm:$0xff]  ;;  %v71_v56 = vld [vmem:[%s1052_s2 + $0x140] sm:$0xff] }
  0x14   :  { %113 = vmatprep.subr.mxu0 %v44_v18  ;;  %v70_v57 = vld [vmem:[%s1052_s2 + $0x138] sm:$0xff]  ;;  %v69_v58 = vld [vmem:[%s1052_s2 + $0x130] sm:$0xff]  ;;  %v68_v59 = vld [vmem:[%s1052_s2 + $0x128] sm:$0xff] }
  0x15   :  { %114 = vmatpush1.msra.mxu0 %v43_v19  ;;  %v67_v60 = vld [vmem:[%s1052_s2 + $0x120] sm:$0xff]  ;;  %v66_v61 = vld [vmem:[%s1052_s2 + $0x118] sm:$0xff]  ;;  %v65_v62 = vld [vmem:[%s1052_s2 + $0x110] sm:$0xff] }
  0x16   :  { %115 = vmatprep.subr.mxu0 %v42_v20  ;;  %v64_v63 = vld [vmem:[%s1052_s2 + $0x108] sm:$0xff]  ;;  %v63_v0 = vld [vmem:[%s1052_s2 + $0x100] sm:$0xff]  ;;  %v891_v4 = vld [vmem:[%s1053_s0 + $0x10] sm:$0xff] }
  0x17   :  { %116 = vmatpush1.msra.mxu0 %v41_v21  ;;  %v874_v1 = vld [vmem:[%s1054_s1] sm:$0xff]  ;;  %v879_v2 = vld [vmem:[%s1053_s0 + $0x8] sm:$0xff]  ;;  %v898_v5 = vld [vmem:[%s1054_s1 + $0x10] sm:$0xff] }
  0x18   :  { %117 = vmatprep.subr.mxu0 %v40_v22  ;;  %v886_v3 = vld [vmem:[%s1054_s1 + $0x8] sm:$0xff]  ;;  %v903_v6 = vld [vmem:[%s1053_s0 + $0x18] sm:$0xff]  ;;  %v277_v9 = vld [vmem:[%s1055_s4 + $0x70] sm:$0xff] }
  0x19   :  { %118 = vmatpush1.msra.mxu0 %v39_v23  ;;  %v910_v7 = vld [vmem:[%s1054_s1 + $0x18] sm:$0xff]  ;;  %v276_v10 = vld [vmem:[%s1055_s4 + $0x68] sm:$0xff]  ;;  %v275_v11 = vld [vmem:[%s1055_s4 + $0x60] sm:$0xff] }
  0x1a   :  { %119 = vmatprep.subr.mxu0 %v38_v25  ;;  %v278_v8 = vld [vmem:[%s1055_s4 + $0x78] sm:$0xff]  ;;  %v273_v13 = vld [vmem:[%s1055_s4 + $0x50] sm:$0xff]  ;;  %v272_v14 = vld [vmem:[%s1055_s4 + $0x48] sm:$0xff] }
  0x1b   :  { %120 = vmatpush1.msra.mxu0 %v37_v26  ;;  %522 = vmatprep.subr.mxu1 %v278_v8  ;;  %v274_v12 = vld [vmem:[%s1055_s4 + $0x58] sm:$0xff]  ;;  %v271_v15 = vld [vmem:[%s1055_s4 + $0x40] sm:$0xff]  ;;  %v269_v17 = vld [vmem:[%s1055_s4 + $0x30] sm:$0xff] }
  0x1c   :  { %121 = vmatprep.subr.mxu0 %v36_v27  ;;  %523 = vmatpush3.msra.mxu1 %v278_v8  ;;  %v270_v16 = vld [vmem:[%s1055_s4 + $0x38] sm:$0xff]  ;;  %v268_v18 = vld [vmem:[%s1055_s4 + $0x28] sm:$0xff]  ;;  %v267_v19 = vld [vmem:[%s1055_s4 + $0x20] sm:$0xff] }
  0x1d   :  { %122 = vmatpush1.msra.mxu0 %v35_v28  ;;  %524 = vmatprep.subr.mxu1 %v277_v9  ;;  %v266_v20 = vld [vmem:[%s1055_s4 + $0x18] sm:$0xff]  ;;  %v265_v21 = vld [vmem:[%s1055_s4 + $0x10] sm:$0xff]  ;;  %v264_v22 = vld [vmem:[%s1055_s4 + $0x8] sm:$0xff] }
  0x1e   :  { %123 = vmatprep.subr.mxu0 %v34_v29  ;;  %525 = vmatpush3.msra.mxu1 %v277_v9  ;;  %v263_v23 = vld [vmem:[%s1055_s4] sm:$0xff]  ;;  %v199_v25 = vld [vmem:[%s1056_s3 + $0x78] sm:$0xff]  ;;  %v186_v8 = vld [vmem:[%s1056_s3 + $0x10] sm:$0xff] }
  0x1f   :  { %124 = vmatpush1.msra.mxu0 %v33_v30  ;;  %526 = vmatprep.subr.mxu1 %v276_v10  ;;  %v185_v9 = vld [vmem:[%s1056_s3 + $0x8] sm:$0xff] }
  0x20   :  { %125 = vmatprep.subr.mxu0 %v32_v31  ;;  %527 = vmatpush3.msra.mxu1 %v276_v10  ;;  %v184_v10 = vld [vmem:[%s1056_s3] sm:$0xff] }
  0x21   :  { %126 = vmatpush1.msra.mxu0 %v31_v32  ;;  %528 = vmatprep.subr.mxu1 %v275_v11 }
  0x22   :  { %127 = vmatprep.subr.mxu0 %v94_v33  ;;  %529 = vmatpush3.msra.mxu1 %v275_v11  ;;  %v473_v11 = vld [vmem:[%s1057_s5] ss:$0 sm:$0xff] }
  0x23   :  { %128 = vmatpush2.msra.mxu0 %v93_v34  ;;  %530 = vmatprep.subr.mxu1 %v274_v12 }
  0x24   :  { %129 = vmatprep.subr.mxu0 %v92_v35  ;;  %531 = vmatpush3.msra.mxu1 %v274_v12 }
  0x25   :  { %130 = vmatpush2.msra.mxu0 %v91_v36  ;;  %532 = vmatprep.subr.mxu1 %v273_v13 }
  0x26   :  { %131 = vmatprep.subr.mxu0 %v90_v37  ;;  %533 = vmatpush3.msra.mxu1 %v273_v13 }
  0x27   :  { %132 = vmatpush2.msra.mxu0 %v89_v38  ;;  %534 = vmatprep.subr.mxu1 %v272_v14 }
  0x28   :  { %133 = vmatprep.subr.mxu0 %v88_v39  ;;  %535 = vmatpush3.msra.mxu1 %v272_v14 }
  0x29   :  { %134 = vmatpush2.msra.mxu0 %v87_v40  ;;  %536 = vmatprep.subr.mxu1 %v271_v15 }
  0x2a   :  { %135 = vmatprep.subr.mxu0 %v86_v41  ;;  %537 = vmatpush3.msra.mxu1 %v271_v15 }
  0x2b   :  { %136 = vmatpush2.msra.mxu0 %v85_v42  ;;  %538 = vmatprep.subr.mxu1 %v270_v16 }
  0x2c   :  { %137 = vmatprep.subr.mxu0 %v84_v43  ;;  %539 = vmatpush3.msra.mxu1 %v270_v16 }
  0x2d   :  { %138 = vmatpush2.msra.mxu0 %v83_v44  ;;  %540 = vmatprep.subr.mxu1 %v269_v17 }
  0x2e   :  { %139 = vmatprep.subr.mxu0 %v82_v45  ;;  %541 = vmatpush3.msra.mxu1 %v269_v17 }
  0x2f   :  { %140 = vmatpush2.msra.mxu0 %v81_v46  ;;  %542 = vmatprep.subr.mxu1 %v268_v18 }
  0x30   :  { %141 = vmatprep.subr.mxu0 %v80_v47  ;;  %543 = vmatpush3.msra.mxu1 %v268_v18 }
  0x31   :  { %142 = vmatpush2.msra.mxu0 %v79_v48  ;;  %544 = vmatprep.subr.mxu1 %v267_v19 }
  0x32   :  { %143 = vmatprep.subr.mxu0 %v78_v49  ;;  %545 = vmatpush3.msra.mxu1 %v267_v19 }
  0x33   :  { %144 = vmatpush2.msra.mxu0 %v77_v50  ;;  %546 = vmatprep.subr.mxu1 %v266_v20  ;;  %v198_v50 = vld [vmem:[%s1056_s3 + $0x70] sm:$0xff] }
  0x34   :  { %145 = vmatprep.subr.mxu0 %v76_v51  ;;  %547 = vmatpush3.msra.mxu1 %v266_v20 }
  0x35   :  { %146 = vmatpush2.msra.mxu0 %v75_v52  ;;  %548 = vmatprep.subr.mxu1 %v265_v21  ;;  %v197_v52 = vld [vmem:[%s1056_s3 + $0x68] sm:$0xff] }
  0x36   :  { %147 = vmatprep.subr.mxu0 %v74_v53  ;;  %549 = vmatpush3.msra.mxu1 %v265_v21 }
  0x37   :  { %148 = vmatpush2.msra.mxu0 %v73_v54  ;;  %550 = vmatprep.subr.mxu1 %v264_v22  ;;  %v196_v54 = vld [vmem:[%s1056_s3 + $0x60] sm:$0xff] }
  0x38   :  { %149 = vmatprep.subr.mxu0 %v72_v55  ;;  %551 = vmatpush3.msra.mxu1 %v264_v22 }
  0x39   :  { %150 = vmatpush2.msra.mxu0 %v71_v56  ;;  %552 = vmatprep.subr.mxu1 %v263_v23  ;;  %v195_v56 = vld [vmem:[%s1056_s3 + $0x58] sm:$0xff] }
  0x3a   :  { %151 = vmatprep.subr.mxu0 %v70_v57  ;;  %553 = vmatpush3.msra.mxu1 %v263_v23 }
  0x3b   :  { %152 = vmatpush2.msra.mxu0 %v69_v58  ;;  %560 = vmatprep.subr.mxu1 %v199_v25  ;;  %v194_v58 = vld [vmem:[%s1056_s3 + $0x50] sm:$0xff] }
  0x3c   :  { %153 = vmatprep.subr.mxu0 %v68_v59  ;;  %v193_v59 = vld [vmem:[%s1056_s3 + $0x48] sm:$0xff] }
  0x3d   :  { %154 = vmatpush2.msra.mxu0 %v67_v60  ;;  %v192_v60 = vld [vmem:[%s1056_s3 + $0x40] sm:$0xff] }
  0x3e   :  { %155 = vmatprep.subr.mxu0 %v66_v61  ;;  %v191_v61 = vld [vmem:[%s1056_s3 + $0x38] sm:$0xff] }
  0x3f   :  { %156 = vmatpush2.msra.mxu0 %v65_v62  ;;  %v190_v62 = vld [vmem:[%s1056_s3 + $0x30] sm:$0xff] }
  0x40   :  { %157 = vmatprep.subr.mxu0 %v64_v63  ;;  %v189_v63 = vld [vmem:[%s1056_s3 + $0x28] sm:$0xff] }
  0x41   :  { %158 = vmatpush2.msra.mxu0 %v63_v0  ;;  %v188_v0 = vld [vmem:[%s1056_s3 + $0x20] sm:$0xff] }
  0x42   :  { %160 = vmatmul.mubr.f32.vlgmr.msra.gmra.mxu0 %v874_v1 }
  0x43   :  { %165 = vmatprep.mubr.f32.mxu0 %v879_v2 }
  0x46   :  { %166 = vmatmul.mubr.f32.gmra.mxu0 %v886_v3 }
  0x47   :  { %171 = vmatprep.mubr.f32.mxu0 %v891_v4 }
  0x4a   :  { %172 = vmatmul.mubr.f32.gmra.mxu0 %v898_v5 }
  0x4b   :  { %177 = vmatprep.mubr.f32.mxu0 %v903_v6 }
  0x4e   :  { %178 = vmatmul.mubr.f32.gmra.mxu0 %v910_v7 }
 0x102   :  { %v964_v26 = vpop.f32.mrf.mxu0 }
 0x103   :  { %v207_v13 = vadd.f32 %v473_v11, %v964_v26 }
 0x104   :  { %v163_v27 = vpop.f32.mrf.mxu0 }
 0x105   :  { %v478_v28 = vmul.f32 -1.442695, %v163_v27  ;;  %v474_v16 = vmul.f32 -1.442695, %v207_v13 }
 0x106   :  { %v966_v29 = vpop.f32.mrf.mxu0 }
 0x107   :  { %598 = vpow2.f32 %v478_v28  ;;  %v208_v12 = vadd.f32 %v473_v11, %v966_v29 }
 0x108   :  { %v169_v30 = vpop.f32.mrf.mxu0 }
 0x109   :  { %v479_v31 = vmul.f32 -1.442695, %v169_v30  ;;  %v475_v14 = vmul.f32 -1.442695, %v208_v12 }
 0x10a   :  { %v968_v32 = vpop.f32.mrf.mxu0 }
 0x10b   :  { %600 = vpow2.f32 %v479_v31  ;;  %v209_v17 = vadd.f32 %v473_v11, %v968_v32 }
 0x10c   :  { %v175_v33 = vpop.f32.mrf.mxu0 }
 0x10d   :  { %v480_v34 = vmul.f32 -1.442695, %v175_v33 }
 0x10e   :  { %v970_v35 = vpop.f32.mrf.mxu0 }
 0x10f   :  { %602 = vpow2.f32 %v480_v34  ;;  %v210_v15 = vadd.f32 %v473_v11, %v970_v35 }
 0x110   :  { %v181_v36 = vpop.f32.mrf.mxu0 }
 0x111   :  { %v481_v37 = vmul.f32 -1.442695, %v181_v36 }
 0x113   :  { %604 = vpow2.f32 %v481_v37 }
 0x114   :  { %v599_v38 = vpop.eup %598 }
 0x115   :  { %v247_v39 = vadd.f32 1.0, %v599_v38 }
 0x117   :  { %606 = vrcp.f32 %v247_v39 }
 0x118   :  { %v601_v40 = vpop.eup %600 }
 0x119   :  { %v248_v41 = vadd.f32 1.0, %v601_v40 }
 0x11b   :  { %608 = vrcp.f32 %v248_v41 }
 0x11c   :  { %v603_v42 = vpop.eup %602 }
 0x11d   :  { %v249_v43 = vadd.f32 1.0, %v603_v42 }
 0x11f   :  { %610 = vrcp.f32 %v249_v43 }
 0x120   :  { %v605_v44 = vpop.eup %604 }
 0x121   :  { %v250_v45 = vadd.f32 1.0, %v605_v44 }
 0x123   :  { %612 = vrcp.f32 %v250_v45 }
 0x124   :  { %v607_v46 = vpop.eup %606  ;;  %614 = vpow2.f32 %v475_v14 }
 0x125   :  { %v259_v47 = vmul.f32 %v607_v46, %v748_v24  ;;  %616 = vpow2.f32 %v474_v16 }
 0x127   :  { %554 = vmatprep.mubr.f32.mxu1 %v259_v47 }
 0x128   :  { %v609_v48 = vpop.eup %608 }
 0x129   :  { %v260_v49 = vmul.f32 %v609_v48, %v879_v2 }
 0x12b   :  { %555 = vmatmul.mubr.f32.vlgmr.msra.gmra.mxu1 %v260_v49 }
 0x12c   :  { %v611_v51 = vpop.eup %610  ;;  %561 = vmatpush3.msra.mxu1 %v199_v25 }
 0x12d   :  { %562 = vmatprep.subr.mxu1 %v198_v50  ;;  %v261_v53 = vmul.f32 %v611_v51, %v891_v4 }
 0x12e   :  { %563 = vmatpush3.msra.mxu1 %v198_v50 }
 0x12f   :  { %564 = vmatprep.subr.mxu1 %v197_v52  ;;  %557 = vmatprep.mubr.f32.mxu1 %v261_v53 }
 0x130   :  { %v613_v55 = vpop.eup %612  ;;  %565 = vmatpush3.msra.mxu1 %v197_v52 }
 0x131   :  { %566 = vmatprep.subr.mxu1 %v196_v54  ;;  %v262_v57 = vmul.f32 %v613_v55, %v903_v6  ;;  %v615_v20 = vpop.eup %614 }
 0x132   :  { %567 = vmatpush3.msra.mxu1 %v196_v54  ;;  %v617_v22 = vpop.eup %616  ;;  %v224_v23 = vadd.f32 1.0, %v615_v20 }
 0x133   :  { %568 = vmatprep.subr.mxu1 %v195_v56  ;;  %558 = vmatmul.mubr.f32.gmra.mxu1 %v262_v57  ;;  %v223_v28 = vadd.f32 1.0, %v617_v22 }
 0x134   :  { %569 = vmatpush3.msra.mxu1 %v195_v56  ;;  %592 = vmatprep.mubr.f32.mxu1 %v874_v1  ;;  %v187_v1 = vld [vmem:[%s1056_s3 + $0x18] sm:$0xff] }
 0x135   :  { %570 = vmatprep.subr.mxu1 %v194_v58 }
 0x136   :  { %571 = vmatpush3.msra.mxu1 %v194_v58 }
 0x137   :  { %572 = vmatprep.subr.mxu1 %v193_v59 }
 0x138   :  { %573 = vmatpush3.msra.mxu1 %v193_v59 }
 0x139   :  { %574 = vmatprep.subr.mxu1 %v192_v60 }
 0x13a   :  { %575 = vmatpush3.msra.mxu1 %v192_v60 }
 0x13b   :  { %576 = vmatprep.subr.mxu1 %v191_v61 }
 0x13c   :  { %577 = vmatpush3.msra.mxu1 %v191_v61 }
 0x13d   :  { %578 = vmatprep.subr.mxu1 %v190_v62 }
 0x13e   :  { %579 = vmatpush3.msra.mxu1 %v190_v62 }
 0x13f   :  { %580 = vmatprep.subr.mxu1 %v189_v63 }
 0x140   :  { %581 = vmatpush3.msra.mxu1 %v189_v63 }
 0x141   :  { %582 = vmatprep.subr.mxu1 %v188_v0 }
 0x142   :  { %583 = vmatpush3.msra.mxu1 %v188_v0 }
 0x143   :  { %584 = vmatprep.subr.mxu1 %v187_v1 }
 0x144   :  { %585 = vmatpush3.msra.mxu1 %v187_v1 }
 0x145   :  { %586 = vmatprep.subr.mxu1 %v186_v8 }
 0x146   :  { %587 = vmatpush3.msra.mxu1 %v186_v8 }
 0x147   :  { %588 = vmatprep.subr.mxu1 %v185_v9 }
 0x148   :  { %589 = vmatpush3.msra.mxu1 %v185_v9 }
 0x149   :  { %590 = vmatprep.subr.mxu1 %v184_v10 }
 0x14a   :  { %591 = vmatpush3.msra.mxu1 %v184_v10 }
 0x14b   :  { %593 = vmatmul.mubr.f32.vlgmr.msra.gmra.mxu1 %v886_v3  ;;  %v477_v3 = vmul.f32 -1.442695, %v210_v15 }
 0x14c   :  { %595 = vmatprep.mubr.f32.mxu1 %v898_v5  ;;  %v476_v5 = vmul.f32 -1.442695, %v209_v17 }
 0x14d   :  { %618 = vpow2.f32 %v477_v3 }
 0x14e   :  { %620 = vpow2.f32 %v476_v5 }
 0x14f   :  { %596 = vmatmul.mubr.f32.gmra.mxu1 %v910_v7 }
 0x15a   :  { %v619_v26 = vpop.eup %618 }
 0x15b   :  { %v621_v31 = vpop.eup %620  ;;  %v226_v32 = vadd.f32 1.0, %v619_v26 }
 0x15c   :  { %v225_v36 = vadd.f32 1.0, %v621_v31 }
 0x1eb   :  { %v556_v7 = vpop.f32.mrf.mxu1 }
 0x1ed   :  { %v345_v18 = vpop.f32.mrf.mxu1 }
 0x1f3   :  { %v559_v19 = vpop.f32.mrf.mxu1 }
 0x1f5   :  { %v355_v21 = vpop.f32.mrf.mxu1 }
 0x20b   :  { %v594_v25 = vpop.f32.mrf.mxu1 }
 0x20c   :  { %v436_v27 = vadd.f32 %v594_v25, %v556_v7 }
 0x20d   :  { %v430_v29 = vpop.f32.mrf.mxu1 }
 0x20e   :  { %622 = vtanh.f32 %v436_v27  ;;  %v431_v30 = vadd.f32 %v430_v29, %v345_v18 }
 0x20f   :  { %624 = vrcp.f32 %v224_v23  ;;  %v597_v33 = vpop.f32.mrf.mxu1 }
 0x210   :  { %626 = vtanh.f32 %v431_v30  ;;  %v446_v34 = vadd.f32 %v597_v33, %v559_v19 }
 0x211   :  { %628 = vrcp.f32 %v223_v28  ;;  %v440_v35 = vpop.f32.mrf.mxu1 }
 0x212   :  { %630 = vtanh.f32 %v446_v34  ;;  %v441_v37 = vadd.f32 %v440_v35, %v355_v21 }
 0x213   :  { %632 = vrcp.f32 %v226_v32 }
 0x214   :  { %634 = vtanh.f32 %v441_v37 }
 0x215   :  { %636 = vrcp.f32 %v225_v36 }
 0x21b   :  { %v623_v38 = vpop.eup %622 }
 0x21c   :  { %v625_v39 = vpop.eup %624  ;;  %v454_v40 = vsub.f32 %v623_v38, %v879_v2 }
 0x21d   :  { %v627_v41 = vpop.eup %626 }
 0x21e   :  { %v629_v42 = vpop.eup %628  ;;  %v458_v43 = vmul.f32 %v625_v39, %v454_v40  ;;  %v453_v44 = vsub.f32 %v627_v41, %v748_v24 }
 0x21f   :  { %v631_v45 = vpop.eup %630 }
 0x220   :  { %v633_v46 = vpop.eup %632  ;;  %v462_v47 = vadd.f32 %v458_v43, %v879_v2  ;;  %v457_v48 = vmul.f32 %v629_v42, %v453_v44  ;;  %v456_v49 = vsub.f32 %v631_v45, %v903_v6 }
 0x221   :  { %v635_v50 = vpop.eup %634 }
 0x222   :  { %466 = vst [vmem:[%s1058_s6 + $0x8] sm:$0xff] %v462_v47  ;;  %v461_v51 = vadd.f32 %v457_v48, %v748_v24  ;;  %v460_v52 = vmul.f32 %v633_v46, %v456_v49  ;;  %v455_v53 = vsub.f32 %v635_v50, %v891_v4  ;;  %v637_v54 = vpop.eup %636 }
 0x224   :  { %465 = vst [vmem:[%s1058_s6] sm:$0xff] %v461_v51  ;;  %v464_v2 = vadd.f32 %v460_v52, %v903_v6  ;;  %v459_v55 = vmul.f32 %v637_v54, %v455_v53 }
 0x226   :  { %468 = vst [vmem:[%s1058_s6 + $0x18] sm:$0xff] %v464_v2  ;;  %v463_v56 = vadd.f32 %v459_v55, %v891_v4 }
 0x228   :  { %467 = vst [vmem:[%s1058_s6 + $0x10] sm:$0xff] %v463_v56 }

</bundles_post_ra>
